<compile_context>
chip_gen: v7x
topology: tpu7x:2x2x1
jax: 0.10.0
libtpu: 0.0.40
codegen_flags: <defaults>
</compile_context>

<pallas_src>
import functools
import math

import jax
import jax.numpy as jnp
from jax import lax
from jax.experimental import pallas as pl
from jax.experimental.pallas import tpu as pltpu

HIDDEN = 64
H2 = 2 * HIDDEN          # fused hidden width (128 = full lane width)
OUT_PAD = 2 * HIDDEN     # lane-dense padded output width (128)


def _round_up(x, m):
    return (x + m - 1) // m * m


# --------------------------------------------------------------------------
# Kernel
# --------------------------------------------------------------------------
def _fused_actor_critic_kernel(continuous, action_dim,
                               state_ref, w1_ref, w2_ref, w3_ref, b_ref,
                               out_ref):
    x = state_ref[...]                               # (TILE_B, state_dim)
    b1 = b_ref[0:1, :]                               # (1, 128)
    b2 = b_ref[1:2, :]
    b3 = b_ref[2:3, :]

    # layer 1: (TILE_B, state_dim) @ (state_dim, 128)
    h = jnp.tanh(jnp.dot(x, w1_ref[...], preferred_element_type=jnp.float32) + b1)
    # layer 2: exact 128x128 MXU tile (block-diagonal actor/critic)
    h = jnp.tanh(jnp.dot(h, w2_ref[...], preferred_element_type=jnp.float32) + b2)
    # layer 3: actor logits in lanes [0:action_dim], critic value at lane action_dim
    z = jnp.dot(h, w3_ref[...], preferred_element_type=jnp.float32) + b3

    lane = lax.broadcasted_iota(jnp.int32, z.shape, 1)
    actor_mask = lane < action_dim

    if continuous:
        # tanh only on actor lanes; critic lane passes through untouched.
        out = jnp.where(actor_mask, jnp.tanh(z), z)
    else:
        # softmax over actor lanes only (padding + critic lane excluded).
        neg = jnp.float32(jnp.finfo(jnp.float32).min)
        masked = jnp.where(actor_mask, z, neg)
        m = jnp.max(masked, axis=-1, keepdims=True)
        e = jnp.where(actor_mask, jnp.exp(z - m), 0.0)
        denom = jnp.sum(e, axis=-1, keepdims=True)
        # approx=True would use the EUP vrcp slot; kept exact for tight tolerance.
        probs = e * pl.reciprocal(denom, approx=False)
        out = jnp.where(actor_mask, probs, z)

    out_ref[...] = out


# --------------------------------------------------------------------------
# Host-side weight fusion (done once, outside the kernel hot loop)
# --------------------------------------------------------------------------
def fuse_params(params, action_dim):
    assert action_dim + 1 <= OUT_PAD, "action_dim too large for fused output slab"
    w1 = jnp.concatenate([params["aw1"], params["cw1"]], axis=1)          # (S, 128)

    w2 = jnp.zeros((H2, H2), jnp.float32)
    w2 = w2.at[:HIDDEN, :HIDDEN].set(params["aw2"])
    w2 = w2.at[HIDDEN:, HIDDEN:].set(params["cw2"])                       # (128, 128)

    w3 = jnp.zeros((H2, OUT_PAD), jnp.float32)
    w3 = w3.at[:HIDDEN, :action_dim].set(params["aw3"])
    w3 = w3.at[HIDDEN:, action_dim:action_dim + 1].set(params["cw3"])     # (128, 128)

    b = jnp.zeros((3, OUT_PAD), jnp.float32)
    b = b.at[0, :HIDDEN].set(params["ab1"][0]).at[0, HIDDEN:].set(params["cb1"][0])
    b = b.at[1, :HIDDEN].set(params["ab2"][0]).at[1, HIDDEN:].set(params["cb2"][0])
    b = b.at[2, :action_dim].set(params["ab3"][0])
    b = b.at[2, action_dim].set(params["cb3"][0, 0])
    return w1, w2, w3, b


# --------------------------------------------------------------------------
# Wrapper
# --------------------------------------------------------------------------
def actor_critic_forward(state, params, *, has_continuous_action_space=True,
                         tile_b=None):
    """Runs both actor and critic MLPs in one fused Pallas kernel.

    Returns (actor_out, state_values):
      actor_out    : (B, action_dim)  -- tanh(mean) if continuous else softmax probs
      state_values : (B, 1)
    """
    B, state_dim = state.shape
    action_dim = params["aw3"].shape[1]

    # Tile choice: 512 rows keeps double-buffered (state + output + activations)
    # well under the scoped VMEM budget, including v7x's smaller 64 MiB part.
    if tile_b is None:
        tile_b = min(512, _round_up(B, 8))
    tile_b = _round_up(tile_b, 8)
    B_pad = _round_up(B, tile_b)
    if B_pad != B:
        state = jnp.pad(state, ((0, B_pad - B), (0, 0)))

    w1, w2, w3, b = fuse_params(params, action_dim)

    kernel = functools.partial(_fused_actor_critic_kernel,
                               has_continuous_action_space, action_dim)

    grid = (B_pad // tile_b,)
    cost = pl.CostEstimate(
        flops=2 * B_pad * (state_dim * H2 + H2 * H2 + H2 * OUT_PAD),
        transcendentals=3 * B_pad * H2,
        bytes_accessed=4 * (B_pad * state_dim + B_pad * OUT_PAD
                            + state_dim * H2 + H2 * H2 + H2 * OUT_PAD + 3 * OUT_PAD),
    )

    out = pl.pallas_call(
        kernel,
        out_shape=jax.ShapeDtypeStruct((B_pad, OUT_PAD), jnp.float32),
        grid=grid,
        in_specs=[
            pl.BlockSpec((tile_b, state_dim), lambda i: (i, 0)),   # batch-tiled state
            pl.BlockSpec((state_dim, H2), lambda i: (0, 0)),       # VMEM-resident weights
            pl.BlockSpec((H2, H2), lambda i: (0, 0)),
            pl.BlockSpec((H2, OUT_PAD), lambda i: (0, 0)),
            pl.BlockSpec((3, OUT_PAD), lambda i: (0, 0)),          # packed biases
        ],
        out_specs=pl.BlockSpec((tile_b, OUT_PAD), lambda i: (i, 0)),  # lane-dense slab
        compiler_params=pltpu.CompilerParams(
            dimension_semantics=("parallel",)),
        cost_estimate=cost,
    )(state, w1, w2, w3, b)

    actor_out = out[:B, :action_dim]
    state_values = out[:B, action_dim:action_dim + 1]
    return actor_out, state_values


def evaluate_continuous(state, action, params, action_var):
    """Equivalent of ActorCritic.evaluate() for the continuous-action branch.

    Distribution math (diagonal MultivariateNormal log-prob / entropy) is plain
    JAX glue on the kernel outputs.
    """
    action_mean, state_values = actor_critic_forward(
        state, params, has_continuous_action_space=True)
    A = action_mean.shape[-1]
    diff = action - action_mean
    log_det = jnp.sum(jnp.log(action_var))
    maha = jnp.sum(diff * diff / action_var, axis=-1)
    action_logprobs = -0.5 * (maha + log_det + A * math.log(2.0 * math.pi))
    dist_entropy = jnp.broadcast_to(
        0.5 * (A * (1.0 + math.log(2.0 * math.pi)) + log_det),
        action_logprobs.shape)
    return action_logprobs, state_values, dist_entropy


# --------------------------------------------------------------------------
# Parameter init + pure-JAX reference
# --------------------------------------------------------------------------
def init_params(key, state_dim, action_dim):
    ks = jax.random.split(key, 12)
    s = 0.1

    def w(k, i, o):
        return (s * jax.random.normal(k, (i, o))).astype(jnp.float32)

    def b(k, o):
        return (s * jax.random.normal(k, (1, o))).astype(jnp.float32)

    return {
        "aw1": w(ks[0], state_dim, HIDDEN), "ab1": b(ks[1], HIDDEN),
        "aw2": w(ks[2], HIDDEN, HIDDEN),    "ab2": b(ks[3], HIDDEN),
        "aw3": w(ks[4], HIDDEN, action_dim), "ab3": b(ks[5], action_dim),
        "cw1": w(ks[6], state_dim, HIDDEN), "cb1": b(ks[7], HIDDEN),
        "cw2": w(ks[8], HIDDEN, HIDDEN),    "cb2": b(ks[9], HIDDEN),
        "cw3": w(ks[10], HIDDEN, 1),        "cb3": b(ks[11], 1),
    }


def _reference(state, params, continuous):
    h = jnp.tanh(state @ params["aw1"] + params["ab1"])
    h = jnp.tanh(h @ params["aw2"] + params["ab2"])
    logits = h @ params["aw3"] + params["ab3"]
    a = jnp.tanh(logits) if continuous else jax.nn.softmax(logits, axis=-1)
    g = jnp.tanh(state @ params["cw1"] + params["cb1"])
    g = jnp.tanh(g @ params["cw2"] + params["cb2"])
    v = g @ params["cw3"] + params["cb3"]
    return a, v


# TODO(synk): dist.sample() of act() (stochastic action draw) is intentionally
# left to jax.random outside the kernel; only the deterministic forward pass
# runs in Pallas.

if __name__ == "__main__":
    batch = 2
    state_dim = 8
    action_dim = 4
    action_std_init = 0.6

    key = jax.random.PRNGKey(0)
    k_param, k_state, k_action, k_big = jax.random.split(key, 4)

    params = init_params(k_param, state_dim, action_dim)
    state = jax.random.normal(k_state, (batch, state_dim), dtype=jnp.float32)
    action = jax.random.normal(k_action, (batch, action_dim), dtype=jnp.float32)
    action_var = jnp.full((action_dim,), action_std_init * action_std_init,
                          dtype=jnp.float32)

    # --- continuous branch (small batch, single grid step with padding) ----
    actor_out, state_values = actor_critic_forward(
        state, params, has_continuous_action_space=True)
    jax.block_until_ready((actor_out, state_values))
    ref_a, ref_v = _reference(state, params, True)
    assert actor_out.shape == (batch, action_dim)
    assert state_values.shape == (batch, 1)
    assert jnp.allclose(actor_out, ref_a, atol=1e-5, rtol=1e-5)
    assert jnp.allclose(state_values, ref_v, atol=1e-5, rtol=1e-5)

    # --- discrete branch (softmax head) ------------------------------------
    probs, vals_d = actor_critic_forward(
        state, params, has_continuous_action_space=False)
    jax.block_until_ready((probs, vals_d))
    ref_p, ref_vd = _reference(state, params, False)
    assert jnp.allclose(probs, ref_p, atol=1e-5, rtol=1e-5)
    assert jnp.allclose(vals_d, ref_vd, atol=1e-5, rtol=1e-5)

    # --- multi-step grid path (batch not a multiple of the tile) -----------
    big_B = 40
    big_state = jax.random.normal(k_big, (big_B, state_dim), dtype=jnp.float32)
    big_a, big_v = actor_critic_forward(
        big_state, params, has_continuous_action_space=True, tile_b=16)
    jax.block_until_ready((big_a, big_v))
    ref_ba, ref_bv = _reference(big_state, params, True)
    assert jnp.allclose(big_a, ref_ba, atol=1e-5, rtol=1e-5)
    assert jnp.allclose(big_v, ref_bv, atol=1e-5, rtol=1e-5)

    # --- evaluate() semantics (distribution glue on kernel outputs) --------
    logp, vals, ent = evaluate_continuous(state, action, params, action_var)
    jax.block_until_ready((logp, vals, ent))

    print("KERNEL_OK")
</pallas_src>

<mosaic_0001>
module attributes {stable_mosaic.version = 11 : i64} {
  func.func @_fused_actor_critic_kernel(%arg0: i32, %arg1: memref<8x8xf32, #tpu.memory_space<vmem>>, %arg2: memref<8x128xf32, #tpu.memory_space<vmem>>, %arg3: memref<128x128xf32, #tpu.memory_space<vmem>>, %arg4: memref<128x128xf32, #tpu.memory_space<vmem>>, %arg5: memref<3x128xf32, #tpu.memory_space<vmem>>, %arg6: memref<8x128xf32, #tpu.memory_space<vmem>>) attributes {dimension_semantics = [#tpu.dimension_semantics<parallel>], iteration_bounds = array<i64: 1>, scalar_prefetch = 0 : i64, scratch_operands = 0 : i64, tpu.core_type = #tpu.core_type<tc>, window_params = [{transform_indices = @transform_0, window_bounds = array<i64: 8, 8>}, {pipeline_mode = #tpu.pipeline_mode<synchronous>, transform_indices = @transform_1, window_bounds = array<i64: 8, 128>}, {pipeline_mode = #tpu.pipeline_mode<synchronous>, transform_indices = @transform_2, window_bounds = array<i64: 128, 128>}, {pipeline_mode = #tpu.pipeline_mode<synchronous>, transform_indices = @transform_3, window_bounds = array<i64: 128, 128>}, {pipeline_mode = #tpu.pipeline_mode<synchronous>, transform_indices = @transform_4, window_bounds = array<i64: 3, 128>}, {transform_indices = @transform_5, window_bounds = array<i64: 8, 128>}]} {
    %c0 = arith.constant 0 : index
    %c0_0 = arith.constant 0 : index
    %0 = vector.load %arg1[%c0, %c0_0] : memref<8x8xf32, #tpu.memory_space<vmem>>, vector<8x8xf32>
    %c0_1 = arith.constant 0 : index
    %c0_2 = arith.constant 0 : index
    %1 = vector.load %arg5[%c0_1, %c0_2] : memref<3x128xf32, #tpu.memory_space<vmem>>, vector<1x128xf32>
    %c1 = arith.constant 1 : index
    %c0_3 = arith.constant 0 : index
    %2 = vector.load %arg5[%c1, %c0_3] : memref<3x128xf32, #tpu.memory_space<vmem>>, vector<1x128xf32>
    %c2 = arith.constant 2 : index
    %c0_4 = arith.constant 0 : index
    %3 = vector.load %arg5[%c2, %c0_4] : memref<3x128xf32, #tpu.memory_space<vmem>>, vector<1x128xf32>
    %c0_5 = arith.constant 0 : index
    %c0_6 = arith.constant 0 : index
    %4 = vector.load %arg2[%c0_5, %c0_6] : memref<8x128xf32, #tpu.memory_space<vmem>>, vector<8x128xf32>
    %cst = arith.constant dense<0.000000e+00> : vector<8x128xf32>
    %5 = tpu.matmul %0, %4, %cst {dimension_numbers = #tpu.dot_dimension_numbers<[1], [0], [0], [1], [0, 0, 1, 1], [], []>} : vector<8x8xf32>, vector<8x128xf32>, vector<8x128xf32> -> vector<8x128xf32>
    %6 = vector.broadcast %1 : vector<1x128xf32> to vector<8x128xf32>
    %7 = arith.addf %5, %6 : vector<8x128xf32>
    %8 = math.tanh %7 : vector<8x128xf32>
    %c0_7 = arith.constant 0 : index
    %c0_8 = arith.constant 0 : index
    %9 = vector.load %arg3[%c0_7, %c0_8] : memref<128x128xf32, #tpu.memory_space<vmem>>, vector<128x128xf32>
    %cst_9 = arith.constant dense<0.000000e+00> : vector<8x128xf32>
    %10 = tpu.matmul %8, %9, %cst_9 {dimension_numbers = #tpu.dot_dimension_numbers<[1], [0], [0], [1], [0, 0, 1, 1], [], []>} : vector<8x128xf32>, vector<128x128xf32>, vector<8x128xf32> -> vector<8x128xf32>
    %11 = vector.broadcast %2 : vector<1x128xf32> to vector<8x128xf32>
    %12 = arith.addf %10, %11 : vector<8x128xf32>
    %13 = math.tanh %12 : vector<8x128xf32>
    %c0_10 = arith.constant 0 : index
    %c0_11 = arith.constant 0 : index
    %14 = vector.load %arg4[%c0_10, %c0_11] : memref<128x128xf32, #tpu.memory_space<vmem>>, vector<128x128xf32>
    %cst_12 = arith.constant dense<0.000000e+00> : vector<8x128xf32>
    %15 = tpu.matmul %13, %14, %cst_12 {dimension_numbers = #tpu.dot_dimension_numbers<[1], [0], [0], [1], [0, 0, 1, 1], [], []>} : vector<8x128xf32>, vector<128x128xf32>, vector<8x128xf32> -> vector<8x128xf32>
    %16 = vector.broadcast %3 : vector<1x128xf32> to vector<8x128xf32>
    %17 = arith.addf %15, %16 : vector<8x128xf32>
    %18 = tpu.iota {dimensions = array<i32: 1>} : vector<8x128xi32>
    %c4_i32 = arith.constant 4 : i32
    %19 = vector.broadcast %c4_i32 : i32 to vector<8x128xi32>
    %20 = arith.cmpi slt, %18, %19 : vector<8x128xi32>
    %21 = math.tanh %17 : vector<8x128xf32>
    %22 = arith.select %20, %21, %17 : vector<8x128xi1>, vector<8x128xf32>
    %c0_13 = arith.constant 0 : index
    %c0_14 = arith.constant 0 : index
    %23 = vector.load %arg6[%c0_13, %c0_14] : memref<8x128xf32, #tpu.memory_space<vmem>>, vector<8x128xf32>
    tpu.vector_store %arg6[%c0_13, %c0_14], %22 {strides = array<i32>} : memref<8x128xf32, #tpu.memory_space<vmem>>, vector<8x128xf32>,
    return
  }
  func.func @transform_0(%arg0: i32) -> (i32, i32) {
    %c0_i32 = arith.constant 0 : i32
    %c0_i32_0 = arith.constant 0 : i32
    return %arg0, %c0_i32 : i32, i32
  }
  func.func @transform_1(%arg0: i32) -> (i32, i32) {
    %c0_i32 = arith.constant 0 : i32
    %c0_i32_0 = arith.constant 0 : i32
    %c0_i32_1 = arith.constant 0 : i32
    return %c0_i32, %c0_i32_0 : i32, i32
  }
  func.func @transform_2(%arg0: i32) -> (i32, i32) {
    %c0_i32 = arith.constant 0 : i32
    %c0_i32_0 = arith.constant 0 : i32
    %c0_i32_1 = arith.constant 0 : i32
    return %c0_i32, %c0_i32_0 : i32, i32
  }
  func.func @transform_3(%arg0: i32) -> (i32, i32) {
    %c0_i32 = arith.constant 0 : i32
    %c0_i32_0 = arith.constant 0 : i32
    %c0_i32_1 = arith.constant 0 : i32
    return %c0_i32, %c0_i32_0 : i32, i32
  }
  func.func @transform_4(%arg0: i32) -> (i32, i32) {
    %c0_i32 = arith.constant 0 : i32
    %c0_i32_0 = arith.constant 0 : i32
    %c0_i32_1 = arith.constant 0 : i32
    return %c0_i32, %c0_i32_0 : i32, i32
  }
  func.func @transform_5(%arg0: i32) -> (i32, i32) {
    %c0_i32 = arith.constant 0 : i32
    %c0_i32_0 = arith.constant 0 : i32
    return %arg0, %c0_i32 : i32, i32
  }
}

</mosaic_0001>

<bundles_post_ra>
// kernel: tpu_custom_call.1
= control target key start
LH: loop header
LB: loop body
LE: loop exit
PB: predicated region body
PF: predicated region fallthrough
CT: control target
= control target key end

     0   :  { %10 = vsyncpa [#allocation3], 0  ;;  %s785_s0 = inlined_call_operand.hbm [shape: f32[8,8], index: 0, kind: input, shape index: {}]   ;;  %s786_s1 = inlined_call_operand.hbm [shape: f32[8,128], index: 1, kind: input, shape index: {}]   ;;  %s787_s2 = inlined_call_operand.hbm [shape: f32[128,128], index: 2, kind: input, shape index: {}]   ;;  %s788_s3 = inlined_call_operand.hbm [shape: f32[128,128], index: 3, kind: input, shape index: {}]   ;;  %s789_s4 = inlined_call_operand.vmem [shape: f32[3,128], index: 4, kind: input, shape index: {}]   ;;  %s790_s5 = inlined_call_operand.hbm [shape: f32[8,128], index: 5, kind: output, shape index: {}]  }
   0x1   :  { %11 = vsyncpa [#allocation6], 0 }
   0x2   :  { %12 = vsyncpa [#allocation9], 0 }
   0x3   :  { %13 = vsyncpa [#allocation4], 0  ;;  %s657_s18 = smov [#allocation5]   ;;  %s658_s20 = smov [#allocation2]  }
   0x4   :  { %s30_s19 = sshll.u32 %s657_s18, 4  ;;  %s20_s21 = sshll.u32 %s658_s20, 4  ;;  %s31_s19 = int_to_ptr.vmem [resolvable:$true] %s30_s19  ;;  %s21_s21 = int_to_ptr.vmem [resolvable:$true] %s20_s21 }
   0x5   :  { %s539_s24 = scalar_lea.hbm %s786_s1, 128 }
   0x6   :  { %p540_p0 = scmp.ne.s32.totalorder %s786_s1, %s539_s24  ;;  %p543_p1 = scmp.lt.u32.totalorder %s539_s24, %s786_s1 }
   0x8   :  { %p545_p2 = pnand %p543_p1, %p540_p0 }
   0xa   :  { %548 = shalt.err (!%p545_p2)
}
   0xb   :  { %s549_s29 = scalar_lea.vmem %s31_s19, 128  ;;  %p554_p4 = scmp.lt.s32.totalorder %s31_s19, %s31_s19 }
   0xc   :  { %p550_p3 = scmp.ne.s32.totalorder %s31_s19, %s549_s29  ;;  %p555_p5 = scmp.lt.s32.totalorder %s549_s29, %s549_s29 }
   0xe   :  { %p556_p6 = por %p555_p5, %p554_p4 }
  0x10   :  { %p557_p7 = pnand %p556_p6, %p550_p3 }
  0x12   :  { %560 = shalt.err (!%p557_p7)
}
  0x13   :  { %33 = dma.hbm_to_vmem [thread:$0]  %s786_s1, 128, %s31_s19, [#allocation6]  }
  0x14   :  { %s561_s9 = scalar_lea.hbm %s785_s0, 128 }
  0x15   :  { %p562_p8 = scmp.ne.s32.totalorder %s785_s0, %s561_s9  ;;  %p565_p9 = scmp.lt.u32.totalorder %s561_s9, %s785_s0 }
  0x17   :  { %p567_p10 = pnand %p565_p9, %p562_p8 }
  0x19   :  { %570 = shalt.err (!%p567_p10)
}
  0x1a   :  { %s571_s14 = scalar_lea.vmem %s21_s21, 128  ;;  %p576_p12 = scmp.lt.s32.totalorder %s21_s21, %s21_s21 }
  0x1b   :  { %p572_p11 = scmp.ne.s32.totalorder %s21_s21, %s571_s14  ;;  %p577_p13 = scmp.lt.s32.totalorder %s571_s14, %s571_s14 }
  0x1d   :  { %p578_p0 = por %p577_p13, %p576_p12 }
  0x1f   :  { %p579_p1 = pnand %p578_p0, %p572_p11 }
  0x21   :  { %582 = shalt.err (!%p579_p1)
}
  0x22   :  { %23 = dma.hbm_to_vmem [thread:$0]  %s785_s0, 128, %s21_s21, [#allocation3]  }
  0x23   :  { %s659_s16 = smov [#allocation7]   ;;  %s583_s20 = scalar_lea.hbm %s787_s2, 2048 }
  0x24   :  { %s39_s17 = sshll.u32 %s659_s16, 4  ;;  %p584_p2 = scmp.ne.s32.totalorder %s787_s2, %s583_s20  ;;  %s40_s17 = int_to_ptr.vmem [resolvable:$true] %s39_s17 }
  0x25   :  { %p587_p3 = scmp.lt.u32.totalorder %s583_s20, %s787_s2 }
  0x27   :  { %p589_p4 = pnand %p587_p3, %p584_p2 }
  0x29   :  { %592 = shalt.err (!%p589_p4)
}
  0x2a   :  { %s593_s26 = scalar_lea.vmem %s40_s17, 2048  ;;  %p598_p6 = scmp.lt.s32.totalorder %s40_s17, %s40_s17 }
  0x2b   :  { %p594_p5 = scmp.ne.s32.totalorder %s40_s17, %s593_s26  ;;  %p599_p7 = scmp.lt.s32.totalorder %s593_s26, %s593_s26 }
  0x2d   :  { %p600_p8 = por %p599_p7, %p598_p6 }
  0x2f   :  { %p601_p9 = pnand %p600_p8, %p594_p5 }
  0x31   :  { %604 = shalt.err (!%p601_p9)
}
  0x32   :  { %s660_s0 = smov 128   ;;  %s661_s21 = smov 8  }
  0x33   :  { %45 = dma.hbm_to_vmem [thread:$0]  %s787_s2, 2048, %s40_s17, [#allocation6], %s660_s0, %s660_s0, %s661_s21  }
  0x34   :  { %s662_s29 = smov [#allocation8]   ;;  %s605_s8 = scalar_lea.hbm %s788_s3, 2048 }
  0x35   :  { %s51_s30 = sshll.u32 %s662_s29, 4  ;;  %p606_p10 = scmp.ne.s32.totalorder %s788_s3, %s605_s8  ;;  %s52_s30 = int_to_ptr.vmem [resolvable:$true] %s51_s30 }
  0x36   :  { %p609_p11 = scmp.lt.u32.totalorder %s605_s8, %s788_s3 }
  0x38   :  { %p611_p12 = pnand %p609_p11, %p606_p10 }
  0x3a   :  { %614 = shalt.err (!%p611_p12)
}
  0x3b   :  { %s615_s13 = scalar_lea.vmem %s52_s30, 2048  ;;  %p620_p0 = scmp.lt.s32.totalorder %s52_s30, %s52_s30 }
  0x3c   :  { %p616_p13 = scmp.ne.s32.totalorder %s52_s30, %s615_s13  ;;  %p621_p1 = scmp.lt.s32.totalorder %s615_s13, %s615_s13 }
  0x3e   :  { %p622_p2 = por %p621_p1, %p620_p0 }
  0x40   :  { %p623_p3 = pnand %p622_p2, %p616_p13 }
  0x42   :  { %626 = shalt.err (!%p623_p3)
}
  0x43   :  { %57 = dma.hbm_to_vmem [thread:$0]  %s788_s3, 2048, %s52_s30, [#allocation9], %s660_s0, %s660_s0, %s661_s21  }
  0x44   :  { %649 = dma.done.wait [#allocation3], 128  }
  0x45   :  { %650 = vsyncadd [#allocation3], 4294967168 }
  0x46   :  { %651 = dma.done.wait [#allocation6], 2176  }
  0x47   :  { %652 = vsyncadd [#allocation6], 4294965120 }
  0x48   :  { %653 = dma.done.wait [#allocation9], 2048  }
  0x49   :  { %654 = vsyncadd [#allocation9], 4294965248  ;;  %v663_v0 = vmov 0.0   ;;  %vm664_vm0 = vmmov 0   ;;  %v665_v1 = vmov 0.0|0.0   ;;  %vm81_vm1 = vcmask 64512  }
  0x4a   :  { %400 = vmatprep.subr.mxu0 %v663_v0  ;;  %402 = vmatprep.mubr.msk.f32.mxu0 %vm664_vm0, %v663_v0  ;;  %v76_v2 = vld [vmem:[#allocation5] sm:$0xff]  ;;  %v72_v3 = vld [vmem:[#allocation2] sm:$0xff]  ;;  %v156_v4 = vld [vmem:[#allocation7] sm:$0xff]  ;;  %s666_s19 = smov [#allocation10]  }
  0x4b   :  { %475 = vmatprep.subr.bf16.mxu1 %v665_v1  ;;  %437 = vmatprep.mubr.msk.f32.mxu1 %vm664_vm0, %v663_v0  ;;  %v157_v5 = vld [vmem:[#allocation7 + $0x8] sm:$0xff]  ;;  %v158_v6 = vld [vmem:[#allocation7 + $0x10] sm:$0xff]  ;;  %v159_v7 = vld [vmem:[#allocation7 + $0x18] sm:$0xff]  ;;  %s349_s20 = sshll.u32 %s666_s19, 4  ;;  %s350_s20 = int_to_ptr.vmem [resolvable:$true] %s349_s20 }
  0x4c   :  { %401 = vmatpush3.msra.mxu0 %v76_v2  ;;  %v476_v8 = vpack.c.bf16 %v157_v5, %v156_v4  ;;  %v479_v9 = vpack.c.bf16 %v159_v7, %v158_v6  ;;  %v160_v10 = vld [vmem:[#allocation7 + $0x20] sm:$0xff]  ;;  %v161_v11 = vld [vmem:[#allocation7 + $0x28] sm:$0xff]  ;;  %v162_v13 = vld [vmem:[#allocation7 + $0x30] sm:$0xff]  ;;  %s627_s22 = scalar_lea.vmem %s350_s20, 128  ;;  %p632_p5 = scmp.lt.s32.totalorder %s350_s20, %s350_s20 }
  0x4d   :  { %403 = vmatmul.mubr.msk.f32.vlgmr.msra.gmra.mrb[0].mxu0 %vm81_vm1, %v72_v3  ;;  %499 = vmatprep.subr.bf16.mxu0 %v665_v1  ;;  %v482_v12 = vpack.c.bf16 %v161_v11, %v160_v10  ;;  %v163_v14 = vld [vmem:[#allocation7 + $0x38] sm:$0xff]  ;;  %v164_v16 = vld [vmem:[#allocation7 + $0x40] sm:$0xff]  ;;  %v165_v17 = vld [vmem:[#allocation7 + $0x48] sm:$0xff]  ;;  %p628_p4 = scmp.ne.s32.totalorder %s350_s20, %s627_s22  ;;  %p633_p6 = scmp.lt.s32.totalorder %s627_s22, %s627_s22 }
  0x4e   :  { %472 = vmatprep.mubr.msk.f32.mxu0 %vm664_vm0, %v663_v0  ;;  %477 = vmatpush3.bf16.msra.mxu1 %v476_v8  ;;  %v485_v15 = vpack.c.bf16 %v163_v14, %v162_v13  ;;  %v488_v18 = vpack.c.bf16 %v165_v17, %v164_v16  ;;  %v166_v19 = vld [vmem:[#allocation7 + $0x50] sm:$0xff]  ;;  %v167_v20 = vld [vmem:[#allocation7 + $0x58] sm:$0xff]  ;;  %v168_v22 = vld [vmem:[#allocation7 + $0x60] sm:$0xff] }
  0x4f   :  { %478 = vmatprep.subr.bf16.mxu1 %v665_v1  ;;  %v491_v21 = vpack.c.bf16 %v167_v20, %v166_v19  ;;  %v169_v23 = vld [vmem:[#allocation7 + $0x68] sm:$0xff]  ;;  %v170_v25 = vld [vmem:[#allocation7 + $0x70] sm:$0xff]  ;;  %v171_v26 = vld [vmem:[#allocation7 + $0x78] sm:$0xff]  ;;  %p634_p7 = por %p633_p6, %p632_p5 }
  0x50   :  { %v494_v24 = vpack.c.bf16 %v169_v23, %v168_v22  ;;  %v497_v27 = vpack.c.bf16 %v171_v26, %v170_v25  ;;  %v247_v28 = vld [vmem:[#allocation8] sm:$0xff]  ;;  %v248_v29 = vld [vmem:[#allocation8 + $0x8] sm:$0xff]  ;;  %v249_v30 = vld [vmem:[#allocation8 + $0x10] sm:$0xff] }
  0x51   :  { %v500_v31 = vpack.c.bf16 %v248_v29, %v247_v28  ;;  %v250_v32 = vld [vmem:[#allocation8 + $0x18] sm:$0xff]  ;;  %v251_v34 = vld [vmem:[#allocation8 + $0x20] sm:$0xff]  ;;  %v252_v35 = vld [vmem:[#allocation8 + $0x28] sm:$0xff]  ;;  %p635_p8 = pnand %p634_p7, %p628_p4 }
  0x52   :  { %480 = vmatpush3.bf16.msra.mxu1 %v479_v9  ;;  %v503_v33 = vpack.c.bf16 %v250_v32, %v249_v30  ;;  %v506_v36 = vpack.c.bf16 %v252_v35, %v251_v34  ;;  %v253_v37 = vld [vmem:[#allocation8 + $0x30] sm:$0xff]  ;;  %v254_v38 = vld [vmem:[#allocation8 + $0x38] sm:$0xff]  ;;  %v255_v40 = vld [vmem:[#allocation8 + $0x40] sm:$0xff] }
  0x53   :  { %481 = vmatprep.subr.bf16.mxu1 %v665_v1  ;;  %501 = vmatpush3.bf16.msra.mxu0 %v500_v31  ;;  %v509_v39 = vpack.c.bf16 %v254_v38, %v253_v37  ;;  %v256_v41 = vld [vmem:[#allocation8 + $0x48] sm:$0xff]  ;;  %v360_v43 = vld [vmem:[%s789_s4] ss:$0 sm:$0xff]  ;;  %v258_v49 = vld [vmem:[#allocation8 + $0x58] sm:$0xff] }
  0x54   :  { %502 = vmatprep.subr.bf16.mxu0 %v665_v1  ;;  %v512_v42 = vpack.c.bf16 %v256_v41, %v255_v40  ;;  %v257_v48 = vld [vmem:[#allocation8 + $0x50] sm:$0xff]  ;;  %v259_v51 = vld [vmem:[#allocation8 + $0x60] sm:$0xff]  ;;  %v260_v52 = vld [vmem:[#allocation8 + $0x68] sm:$0xff] }
  0x55   :  { %v515_v50 = vpack.c.bf16 %v258_v49, %v257_v48  ;;  %v518_v53 = vpack.c.bf16 %v260_v52, %v259_v51  ;;  %v261_v54 = vld [vmem:[#allocation8 + $0x70] sm:$0xff]  ;;  %v262_v55 = vld [vmem:[#allocation8 + $0x78] sm:$0xff] }
  0x56   :  { %483 = vmatpush3.bf16.msra.mxu1 %v482_v12  ;;  %v521_v56 = vpack.c.bf16 %v262_v55, %v261_v54  ;;  %v362_v57 = vld [vmem:[%s789_s4 + $0x1] ss:$0 sm:$0xff]  ;;  %v363_v62 = vld [vmem:[%s789_s4 + $0x2] ss:$0 sm:$0xff] }
  0x57   :  { %484 = vmatprep.subr.bf16.mxu1 %v665_v1  ;;  %504 = vmatpush3.bf16.msra.mxu0 %v503_v33 }
  0x58   :  { %505 = vmatprep.subr.bf16.mxu0 %v665_v1 }
  0x5a   :  { %486 = vmatpush3.bf16.msra.mxu1 %v485_v15 }
  0x5b   :  { %487 = vmatprep.subr.bf16.mxu1 %v665_v1  ;;  %507 = vmatpush3.bf16.msra.mxu0 %v506_v36 }
  0x5c   :  { %508 = vmatprep.subr.bf16.mxu0 %v665_v1 }
  0x5e   :  { %489 = vmatpush3.bf16.msra.mxu1 %v488_v18 }
  0x5f   :  { %490 = vmatprep.subr.bf16.mxu1 %v665_v1  ;;  %510 = vmatpush3.bf16.msra.mxu0 %v509_v39 }
  0x60   :  { %511 = vmatprep.subr.bf16.mxu0 %v665_v1 }
  0x62   :  { %492 = vmatpush3.bf16.msra.mxu1 %v491_v21 }
  0x63   :  { %493 = vmatprep.subr.bf16.mxu1 %v665_v1  ;;  %513 = vmatpush3.bf16.msra.mxu0 %v512_v42 }
  0x64   :  { %514 = vmatprep.subr.bf16.mxu0 %v665_v1 }
  0x66   :  { %495 = vmatpush3.bf16.msra.mxu1 %v494_v24 }
  0x67   :  { %496 = vmatprep.subr.bf16.mxu1 %v665_v1  ;;  %516 = vmatpush3.bf16.msra.mxu0 %v515_v50 }
  0x68   :  { %517 = vmatprep.subr.bf16.mxu0 %v665_v1 }
  0x6a   :  { %498 = vmatpush3.bf16.msra.mxu1 %v497_v27 }
  0x6b   :  { %519 = vmatpush3.bf16.msra.mxu0 %v518_v53 }
  0x6c   :  { %520 = vmatprep.subr.bf16.mxu0 %v665_v1  ;;  %v337_v1 = vlaneseq }
  0x6e   :  { %v338_v3 = vand.u32 127, %v337_v1 }
  0x6f   :  { %522 = vmatpush3.bf16.msra.mxu0 %v521_v56 }
  0x70   :  { %vm339_vm2 = vcmp.lt.s32.totalorder %v338_v3, 4 }
 0x120   :  { %v151_v44 = vpop.f32.mrb[0].mxu0 }
 0x121   :  { %v152_v45 = vadd.f32 %v360_v43, %v151_v44  ;;  %v404_v46 = vpop.f32.mrb[1].mxu0 }
 0x123   :  { %533 = vtanh.f32 %v152_v45 }
 0x12d   :  { %v534_v47 = vpop.eup %533 }
 0x12e   :  { %438 = vmatmul.mubr.f32.vlgmr.msra.gmra.mrb[0].mxu1 %v534_v47 }
 0x201   :  { %v242_v58 = vpop.f32.mrb[0].mxu1 }
 0x202   :  { %v243_v59 = vadd.f32 %v362_v57, %v242_v58  ;;  %v439_v60 = vpop.f32.mrb[1].mxu1 }
 0x204   :  { %535 = vtanh.f32 %v243_v59 }
 0x20e   :  { %v536_v61 = vpop.eup %535 }
 0x20f   :  { %473 = vmatmul.mubr.f32.vlgmr.msra.gmra.mrb[2].mxu0 %v536_v61 }
 0x2e2   :  { %v333_v63 = vpop.f32.mrb[2].mxu0 }
 0x2e3   :  { %v334_v0 = vadd.f32 %v363_v62, %v333_v63  ;;  %v474_v2 = vpop.f32.mrb[3].mxu0 }
 0x2e5   :  { %537 = vtanh.f32 %v334_v0 }
 0x2ef   :  { %v538_v4 = vpop.eup %537 }
 0x2f0   :  { %v341_v5 = vsel %vm339_vm2, %v538_v4, %v334_v0 }
 0x2f1   :  { %342 = vst [vmem:[#allocation10] sm:$0xff] %v341_v5 }
 0x2f2   :  { %638 = shalt.err (!%p635_p8)
}
 0x2f3   :  { %s639_s24 = scalar_lea.hbm %s790_s5, 128 }
 0x2f4   :  { %p640_p9 = scmp.ne.s32.totalorder %s790_s5, %s639_s24  ;;  %p643_p10 = scmp.lt.u32.totalorder %s639_s24, %s790_s5 }
 0x2f6   :  { %p645_p11 = pnand %p643_p10, %p640_p9 }
 0x2f8   :  { %648 = shalt.err (!%p645_p11)
}
 0x2f9   :  { %352 = dma.vmem_to_hbm [thread:$0]  %s350_s20, 128, %s790_s5, [#allocation4]  }
 0x2fa   :  { %655 = dma.done.wait [#allocation4], 128  }
 0x2fb   :  { %656 = vsyncadd [#allocation4], 4294967168 }
 0x2fc   :  { %356 = vsyncpa [#allocation3], 1 }
 0x2fd   :  { %357 = vsyncpa [#allocation6], 1 }
 0x2fe   :  { %358 = vsyncpa [#allocation9], 1 }
 0x2ff   :  { %359 = vsyncpa [#allocation4], 1 }

</bundles_post_ra>
